<compile_context>
chip_gen: v7x
topology: tpu7x:2x2x1
jax: 0.10.0
libtpu: 0.0.40
codegen_flags: <defaults>
</compile_context>

<pallas_src>
import jax
import jax.numpy as jnp
import numpy as np
from jax.experimental import pallas as pl
from jax.experimental.pallas import tpu as pltpu


def _round_up(x, m):
    return (x + m - 1) // m * m


def _vmem_limit(*block_bytes):
    # Double-buffered blocks + headroom; explicit so bigger tiles never hit a
    # silent scoped-VMEM default (v5e 16 MiB / v6e 32 MiB / v7x 32 MiB).
    need = 2 * sum(int(b) for b in block_bytes)
    return int(min(32 * 1024 * 1024, max(8 * 1024 * 1024, need + 2 * 1024 * 1024)))


# ----------------------------------------------------------------------------
# Kernel 1: 5-channel conv1 stem as an im2col matmul on the MXU.
# ----------------------------------------------------------------------------
def _stem_matmul_kernel(p_ref, w_ref, o_ref):
    # p: [TM, Kp] bf16 im2col patches (streamed), w: [Kp, Np] bf16 (resident),
    # o: [TM, Np] bf16 (f32 MXU accumulation, cast at the store).
    acc = jnp.dot(p_ref[...], w_ref[...], preferred_element_type=jnp.float32)
    o_ref[...] = acc.astype(o_ref.dtype)


def conv1_stem(x, w, *, stride=2, pad=3):
    """x: [B, 5, H, W] f32, w: [64, 5, 7, 7] f32 -> [B, 64, Ho, Wo] bf16."""
    B, C, H, W = x.shape
    O, Ci, KH, KW = w.shape
    assert Ci == C
    Ho = (H + 2 * pad - KH) // stride + 1
    Wo = (W + 2 * pad - KW) // stride + 1

    # im2col in the wrapper (layout plumbing; all compute stays in the kernel).
    xp = jnp.pad(x, ((0, 0), (0, 0), (pad, pad), (pad, pad)))
    cols = [xp[:, :, i:i + stride * (Ho - 1) + 1:stride,
                     j:j + stride * (Wo - 1) + 1:stride]
            for i in range(KH) for j in range(KW)]               # each [B, C, Ho, Wo]
    patches = jnp.stack(cols, axis=2)                            # [B, C, KH*KW, Ho, Wo]
    patches = patches.transpose(0, 3, 4, 1, 2).reshape(B * Ho * Wo, C * KH * KW)
    patches = patches.astype(jnp.bfloat16)        # bf16 streaming (same rounding point)

    K = C * KH * KW                       # 245
    Kp = _round_up(K, 128)                # pad contraction dim to full lanes (256)
    Np = _round_up(O, 128)                # lane-dense output (no masked vst), sliced below
    M = B * Ho * Wo

    TM = min(2048, _round_up(M, 8))       # big row tile: amortize per-step overhead
    if _round_up(M, TM) // TM < 2 and M > 8:
        # keep >= 2 grid steps so the "parallel" axis splits across v7x's 2 TCs
        TM = _round_up(-(-M // 2), 8)
    Mp = _round_up(M, TM)

    patches = jnp.pad(patches, ((0, Mp - M), (0, Kp - K)))
    w_mat = w.reshape(O, K).T                                    # [K, O]  (x @ W layout)
    w_mat = jnp.pad(w_mat, ((0, Kp - K), (0, Np - O))).astype(jnp.bfloat16)

    block_bytes = (TM * Kp * 2, Kp * Np * 2, TM * Np * 2)
    out = pl.pallas_call(
        _stem_matmul_kernel,
        out_shape=jax.ShapeDtypeStruct((Mp, Np), jnp.bfloat16),
        grid=(Mp // TM,),
        in_specs=[
            pl.BlockSpec((TM, Kp), lambda i: (i, 0)),   # bf16 patch stream, double-buffered
            pl.BlockSpec((Kp, Np), lambda i: (0, 0)),   # weight DMA'd once, resident
        ],
        out_specs=pl.BlockSpec((TM, Np), lambda i: (i, 0)),
        compiler_params=pltpu.CompilerParams(
            dimension_semantics=("parallel",),          # megacore sharding on v7x
            vmem_limit_bytes=_vmem_limit(*block_bytes)),
        cost_estimate=pl.CostEstimate(
            flops=2 * Mp * Kp * Np,
            transcendentals=0,
            bytes_accessed=Mp * Kp * 2 + Kp * Np * 2 + Mp * Np * 2),
    )(patches, w_mat)

    return out[:M, :O].reshape(B, Ho, Wo, O).transpose(0, 3, 1, 2)


# ----------------------------------------------------------------------------
# Kernel 2: fused global-average-pool + fc head (the module's replaced head).
# ----------------------------------------------------------------------------
def _pool_fc_kernel(f_ref, w_ref, b_ref, o_ref):
    # f: [S, TB, C] bf16 body features; w: [C, Np] bf16 (resident);
    # b: [1, Np] f32; o: [TB, Np] f32.
    S = f_ref.shape[0]
    # Ref-sliced accumulation: one (TB, C) lane-dense plane live at a time,
    # f32 accumulation on the VPU (no whole-block load, no sublane reduction).
    acc = f_ref[0].astype(jnp.float32)
    for s in range(1, S):                  # static, small spatial extent
        acc = acc + f_ref[s].astype(jnp.float32)
    pooled = acc * (1.0 / S)               # global average pool in f32
    logits = jnp.dot(pooled.astype(jnp.bfloat16), w_ref[...],
                     preferred_element_type=jnp.float32)
    o_ref[...] = logits + b_ref[...]       # bias add in f32


def pool_fc_head(feats, w_fc, b_fc):
    """feats: [B, C, Hf, Wf] f32; w_fc: [num_classes, C]; b_fc: [num_classes]."""
    B, C, Hf, Wf = feats.shape
    NC = w_fc.shape[0]
    S = Hf * Wf

    Np = _round_up(NC, 128)               # lane-dense output, slice in wrapper

    # Batch tile from a per-generation-safe VMEM budget: feature block is
    # S*TB*C*2 bytes (bf16) and gets double-buffered; keep it <= ~4 MiB per
    # buffer so v5e's 16 MiB scoped default and real S=49 features are safe.
    feat_budget = 4 * 1024 * 1024
    TB = max(8, min(256, (feat_budget // (S * C * 2)) // 8 * 8))
    TB = min(TB, _round_up(B, 8))
    Bp = _round_up(B, TB)

    # [S, B, C]: (TB, C) on (sublane, lane) — sublane-full, lane-dense planes.
    f = feats.astype(jnp.bfloat16).reshape(B, C, S).transpose(2, 0, 1)   # [S, B, C]
    f = jnp.pad(f, ((0, 0), (0, Bp - B), (0, 0)))
    w = jnp.pad(w_fc.T, ((0, 0), (0, Np - NC))).astype(jnp.bfloat16)     # [C, Np]
    b = jnp.pad(b_fc, (0, Np - NC)).reshape(1, Np).astype(jnp.float32)

    block_bytes = (S * TB * C * 2, C * Np * 2, Np * 4, TB * Np * 4)
    out = pl.pallas_call(
        _pool_fc_kernel,
        out_shape=jax.ShapeDtypeStruct((Bp, Np), jnp.float32),
        grid=(Bp // TB,),
        in_specs=[
            pl.BlockSpec((S, TB, C), lambda i: (0, i, 0)),   # bf16 batch tile streamed
            pl.BlockSpec((C, Np), lambda i: (0, 0)),         # fc weight resident
            pl.BlockSpec((1, Np), lambda i: (0, 0)),         # bias resident
        ],
        out_specs=pl.BlockSpec((TB, Np), lambda i: (i, 0)),
        compiler_params=pltpu.CompilerParams(
            dimension_semantics=("parallel",),
            vmem_limit_bytes=_vmem_limit(*block_bytes)),
        cost_estimate=pl.CostEstimate(
            flops=Bp * S * C + 2 * Bp * C * Np,
            transcendentals=0,
            bytes_accessed=S * Bp * C * 2 + C * Np * 2 + Np * 4 + Bp * Np * 4),
    )(f, w, b)
    return out[:B, :NC]


# ----------------------------------------------------------------------------
# Parameter init replicating the module's conv1 weight surgery.
# ----------------------------------------------------------------------------
def init_conv1_weight(key):
    # TODO(synk): pretrained torchvision resnet50 conv1 weights are unavailable
    # offline; use a deterministic stand-in of the same shape and apply the
    # module's exact weight surgery.
    original = jax.random.normal(key, (64, 3, 7, 7), jnp.float32) * 0.05
    mean_orig = jnp.mean(original, axis=1)                       # [64, 7, 7]
    w = jnp.zeros((64, 5, 7, 7), jnp.float32)
    w = w.at[:, 1:4].set(original)
    w = w.at[:, 0].set(mean_orig)
    w = w.at[:, 4].set(mean_orig)
    return w * (3.0 / 5.0)


if __name__ == "__main__":
    key = jax.random.PRNGKey(0)
    k_img, k_conv, k_feat, k_w, k_b = jax.random.split(key, 5)

    # ---- early fusion: per-modality images concatenated to 5 channels ----
    B, H, W = 2, 16, 16
    modalities = ("pre", "rgb", "post")          # 1 + 3 + 1 = 5 channels total
    chans = {"pre": 1, "rgb": 3, "post": 1}
    mkeys = jax.random.split(k_img, len(modalities))
    images = {m: jax.random.normal(kk, (B, chans[m], H, W), jnp.float32)
              for m, kk in zip(modalities, mkeys)}
    x5 = jnp.concatenate([images[m] for m in modalities], axis=1)   # [B, 5, 16, 16]

    # ---- kernel 1: modified conv1 stem ----
    w_conv1 = init_conv1_weight(k_conv)
    stem = jax.block_until_ready(conv1_stem(x5, w_conv1))
    assert stem.shape == (B, 64, 8, 8)

    # Reference with the same bf16 operand rounding, f32 accumulation, and
    # bf16 output rounding (tolerance widened for the bf16 output cast).
    xr = x5.astype(jnp.bfloat16).astype(jnp.float32)
    wr = w_conv1.astype(jnp.bfloat16).astype(jnp.float32)
    ref_stem = jax.lax.conv_general_dilated(
        xr, wr, window_strides=(2, 2), padding=((3, 3), (3, 3)),
        dimension_numbers=("NCHW", "OIHW", "NCHW"),
        precision=jax.lax.Precision.HIGHEST)
    np.testing.assert_allclose(np.asarray(stem.astype(jnp.float32)),
                               np.asarray(ref_stem), rtol=1e-2, atol=1e-2)

    # TODO(synk): pretrained ResNet-50 body not translated; head demonstrated on
    # body-shaped stand-in features [B, 2048, 2, 2].

    # ---- kernel 2: fused avgpool + new fc head ----
    num_features, num_classes, Hf, Wf = 2048, 10, 2, 2
    feats = jax.random.normal(k_feat, (B, num_features, Hf, Wf), jnp.float32)
    bound = 1.0 / np.sqrt(num_features)
    w_fc = jax.random.uniform(k_w, (num_classes, num_features), jnp.float32, -bound, bound)
    b_fc = jax.random.uniform(k_b, (num_classes,), jnp.float32, -bound, bound)

    logits = jax.block_until_ready(pool_fc_head(feats, w_fc, b_fc))
    assert logits.shape == (B, num_classes)

    # Reference matches the kernel's rounding points: bf16 features pooled in
    # f32, bf16 pooled activations / weights, f32 accumulation + bias.
    fr = feats.astype(jnp.bfloat16).astype(jnp.float32)
    pooled = jnp.mean(fr.reshape(B, num_features, Hf * Wf), axis=-1)
    pr = pooled.astype(jnp.bfloat16).astype(jnp.float32)
    wfr = w_fc.astype(jnp.bfloat16).astype(jnp.float32)
    ref_logits = jnp.dot(pr, wfr.T, precision=jax.lax.Precision.HIGHEST) + b_fc
    np.testing.assert_allclose(np.asarray(logits), np.asarray(ref_logits),
                               rtol=2e-3, atol=2e-3)

    print("KERNEL_OK")
</pallas_src>

<mosaic_0001>
module attributes {stable_mosaic.version = 11 : i64} {
  func.func @_stem_matmul_kernel(%arg0: i32, %arg1: memref<64x256xbf16, #tpu.memory_space<vmem>>, %arg2: memref<256x128xbf16, #tpu.memory_space<vmem>>, %arg3: memref<64x128xbf16, #tpu.memory_space<vmem>>) attributes {dimension_semantics = [#tpu.dimension_semantics<parallel>], iteration_bounds = array<i64: 2>, scalar_prefetch = 0 : i64, scratch_operands = 0 : i64, tpu.core_type = #tpu.core_type<tc>, window_params = [{transform_indices = @transform_0, window_bounds = array<i64: 64, 256>}, {pipeline_mode = #tpu.pipeline_mode<synchronous>, transform_indices = @transform_1, window_bounds = array<i64: 256, 128>}, {transform_indices = @transform_2, window_bounds = array<i64: 64, 128>}]} {
    %c0 = arith.constant 0 : index
    %c0_0 = arith.constant 0 : index
    %0 = vector.load %arg1[%c0, %c0_0] : memref<64x256xbf16, #tpu.memory_space<vmem>>, vector<64x256xbf16>
    %c0_1 = arith.constant 0 : index
    %c0_2 = arith.constant 0 : index
    %1 = vector.load %arg2[%c0_1, %c0_2] : memref<256x128xbf16, #tpu.memory_space<vmem>>, vector<256x128xbf16>
    %cst = arith.constant dense<0.000000e+00> : vector<64x128xf32>
    %2 = tpu.matmul %0, %1, %cst {dimension_numbers = #tpu.dot_dimension_numbers<[1], [0], [0], [1], [0, 0, 1, 1], [], []>} : vector<64x256xbf16>, vector<256x128xbf16>, vector<64x128xf32> -> vector<64x128xf32>
    %3 = arith.truncf %2 : vector<64x128xf32> to vector<64x128xbf16>
    %c0_3 = arith.constant 0 : index
    %c0_4 = arith.constant 0 : index
    %4 = vector.load %arg3[%c0_3, %c0_4] : memref<64x128xbf16, #tpu.memory_space<vmem>>, vector<64x128xbf16>
    tpu.vector_store %arg3[%c0_3, %c0_4], %3 {strides = array<i32>} : memref<64x128xbf16, #tpu.memory_space<vmem>>, vector<64x128xbf16>,
    return
  }
  func.func @transform_0(%arg0: i32) -> (i32, i32) {
    %c0_i32 = arith.constant 0 : i32
    %c0_i32_0 = arith.constant 0 : i32
    return %arg0, %c0_i32 : i32, i32
  }
  func.func @transform_1(%arg0: i32) -> (i32, i32) {
    %c0_i32 = arith.constant 0 : i32
    %c0_i32_0 = arith.constant 0 : i32
    %c0_i32_1 = arith.constant 0 : i32
    return %c0_i32, %c0_i32_0 : i32, i32
  }
  func.func @transform_2(%arg0: i32) -> (i32, i32) {
    %c0_i32 = arith.constant 0 : i32
    %c0_i32_0 = arith.constant 0 : i32
    return %arg0, %c0_i32 : i32, i32
  }
}

</mosaic_0001>

<bundles_post_ra>
// kernel: tpu_custom_call.1
= control target key start
LH: loop header
LB: loop body
LE: loop exit
PB: predicated region body
PF: predicated region fallthrough
CT: control target
= control target key end

     0   :  { %7 = vsyncpa [#allocation3], 0  ;;  %s1155_s0 = inlined_call_operand.hbm [shape: bf16[128,256], index: 0, kind: input, shape index: {}]   ;;  %s1156_s1 = inlined_call_operand.hbm [shape: bf16[256,128], index: 1, kind: input, shape index: {}]   ;;  %s1157_s2 = inlined_call_operand.hbm [shape: bf16[128,128], index: 2, kind: output, shape index: {}]  }
   0x1   :  { %9 = vsyncpa [#allocation3 + $0x1], 0 }
   0x2   :  { %10 = vsyncpa [#allocation6], 0 }
   0x3   :  { %11 = vsyncpa [#allocation4], 0 }
   0x4   :  { %13 = vsyncpa [#allocation4 + $0x1], 0  ;;  %s943_s9 = smov 0   ;;  %s945_s10 = smov 0  }
   0x5   :  { %s947_s11 = smov 0   ;;  %s949_s12 = smov 0  }
   0x6 LB: > { %s964_s13 = sadd.s32 4294967295, %s917_s12   ;;  %s559_s14 = sadd.s32 4294967294, %s917_s12   ;;  %s917_s12 = sphi %s949_s12, %s1177_s12   ;;  %s913_s11 = sphi %s947_s11, %s1176_s11   ;;  %s909_s10 = sphi %s945_s10, %s1175_s10   ;;  %s905_s9 = sphi %s943_s9, %s1174_s9  }
   0x7   : > { %p39_p0 = scmp.ne.s32.totalorder %s909_s10, %s905_s9  ;;  %p1158_p1 = scmp.eq.s32.totalorder %s964_s13, 0 }
   0x8   : > { %p90_p3 = scmp.eq.s32.totalorder %s559_s14, 1  ;;  %p560_p5 = scmp.ge.s32.totalorder %s917_s12, 1 }
   0x9   : > { %p973_p4 = por %p1158_p1, %p39_p0  ;;  %p97_p7 = scmp.lt.s32.totalorder %s917_s12, 3 }
   0xa   : > { %p978_p6 = por %p90_p3, %p39_p0  ;;  %s919_s18 = smov [#allocation5]  }
   0xb   : > { %s1161_s15 = scalar_select %p973_p4, 1, 0 }
   0xc   : > { %s1162_s16 = scalar_select %p978_p6, 1, 0 }
   0xd   : > { %p983_p8 = pnand %p560_p5, %p97_p7  ;;  %s109_s19 = sshll.u32 %s919_s18, 4  ;;  %s987_s19 = int_to_ptr.vmem [resolvable:$true] %s109_s19 }
   0xe   : > { %s999_s21 = sadd.s32 1, %s917_s12   ;;  %s26_s22 = sadd.s32 1, %s913_s11 }
   0xf   : > { %s1163_s17 = scalar_select %p983_p8, 1, 0 }
  0x10   : > { %p706_p9 = pneg %p983_p8  ;;  %s23_s23 = ssub.s32 %s917_s12, %s999_s21 }
  0x11   : > { %s789_s26 = scalar_lea.hbm %s1156_s1, 2048 }
  0x12   : > { %p994_p11 = pnand %p706_p9, %p1158_p1  ;;  %p790_p12 = scmp.ne.s32.totalorder %s1156_s1, %s789_s26 }
  0x13   : > { %p796_p5 = scmp.lt.u32.totalorder %s789_s26, %s1156_s1 }
  0x14   : > { %p791_p13 = pneg %p994_p11 }
  0x16   : > { %p792_p0 = pnand %p791_p13, %p790_p12 }
  0x18   : > { %p793_p3 = pneg %p792_p0 }
  0x1a   : > { %p798_p7 = pnand %p796_p5, %p793_p3 }
  0x1c   : > { %801 = shalt.err (!%p798_p7)
}
  0x1d   : > { %s802_s3 = scalar_lea.vmem %s987_s19, 2048  ;;  %p810_p2 = scmp.lt.s32.totalorder %s987_s19, %s987_s19 }
  0x1e   : > { %p803_p9 = scmp.ne.s32.totalorder %s987_s19, %s802_s3  ;;  %p811_p6 = scmp.lt.s32.totalorder %s802_s3, %s802_s3 }
  0x20   : > { %p805_p10 = pnand %p803_p9, %p791_p13  ;;  %p812_p4 = por %p811_p6, %p810_p2 }
  0x22   : > { %p806_p1 = pneg %p805_p10 }
  0x24   : > { %p813_p8 = pnand %p812_p4, %p806_p1 }
  0x26   : > { %816 = shalt.err (!%p813_p8)
}
  0x27   : > { %s920_s4 = smov 64   ;;  %s921_s5 = smov 4  }
  0x28   : > { %709 = dma.hbm_to_vmem [thread:$0]  (!%p994_p11), %s1156_s1, 2048, %s987_s19, [#allocation6], %s920_s4, %s920_s4, %s921_s5  }
  0x29   : > { %p24_p2 = scmp.eq.s32.totalorder %s23_s23, 0  ;;  %p33_p1 = scmp.ne.s32.totalorder %s913_s11, %s909_s10 }
  0x2a   : > { %p34_p4 = scmp.eq.s32.totalorder %s917_s12, 0  ;;  %p719_p6 = scmp.lt.s32.totalorder %s917_s12, 2 }
  0x2b   : > { %s1030_s8 = scalar_select %p24_p2, %s913_s11, %s26_s22  }
  0x2c   : > { %p35_p8 = por %p34_p4, %p33_p1  ;;  %p1165_p10 = scmp.eq.s32.totalorder %s964_s13, 1 }
  0x2d   : > { %s123_s18 = sand.u32 1, %s913_s11   ;;  %s609_s24 = sshll.u32 %s917_s12, 10 }
  0x2e   : > { %p1034_p12 = por %p1165_p10, %p33_p1  ;;  %s563_s25 = sshll.u32 %s123_s18, 6 }
  0x2f   : > { %s1043_s27 = scalar_lea.hbm %s1155_s0, %s609_s24  ;;  %s127_s19 = scalar_lea.vmem [#allocation2], %s563_s25 }
  0x30   : > { %s135_s22 = sshll.u32 %s127_s19, 4  ;;  %p1045_p11 = pnand %p719_p6, %p35_p8  ;;  %s1049_s22 = int_to_ptr.vmem [resolvable:$true] %s135_s22 }
  0x31   : > { %s1051_s28 = scalar_lea.sflag [#allocation3], %s123_s18  ;;  %s817_s29 = scalar_lea.hbm %s1043_s27, 1024 }
  0x32   : > { %p818_p13 = scmp.ne.s32.totalorder %s1043_s27, %s817_s29  ;;  %p819_p0 = pneg %p1045_p11 }
  0x33   : > { %s822_s4 = scalar_lea.hbm %s1155_s0, 2048  ;;  %p823_p7 = scmp.lt.u32.totalorder %s1043_s27, %s1155_s0 }
  0x34   : > { %p820_p3 = pnand %p819_p0, %p818_p13  ;;  %p824_p9 = scmp.lt.u32.totalorder %s822_s4, %s817_s29 }
  0x35   : > { %p826_p1 = scmp.lt.u32.totalorder %s817_s29, %s1043_s27 }
  0x36   : > { %p821_p5 = pneg %p820_p3  ;;  %p825_p2 = por %p824_p9, %p823_p7 }
  0x38   : > { %p827_p4 = por %p826_p1, %p825_p2 }
  0x3a   : > { %p828_p6 = pnand %p827_p4, %p821_p5 }
  0x3c   : > { %831 = shalt.err (!%p828_p6)
}
  0x3d   : > { %s832_s7 = scalar_lea.vmem %s1049_s22, 1024  ;;  %s922_s18 = smov [#allocation2]  }
  0x3e   : > { %p833_p8 = scmp.ne.s32.totalorder %s1049_s22, %s832_s7  ;;  %s837_s24 = sshll.u32 %s922_s18, 4  ;;  %s838_s24 = int_to_ptr.vmem [resolvable:$false] %s837_s24 }
  0x3f   : > { %s839_s25 = scalar_lea.vmem %s838_s24, 2048  ;;  %p840_p3 = scmp.lt.s32.totalorder %s1049_s22, %s838_s24 }
  0x40   : > { %p835_p10 = pnand %p833_p8, %p819_p0  ;;  %p841_p7 = scmp.lt.s32.totalorder %s839_s25, %s832_s7 }
  0x42   : > { %p836_p13 = pneg %p835_p10  ;;  %p842_p9 = por %p841_p7, %p840_p3 }
  0x44   : > { %p843_p2 = pnand %p842_p9, %p836_p13 }
  0x46   : > { %846 = shalt.err (!%p843_p2)
}
  0x47   : > { %s923_s20 = smov 128   ;;  %s924_s26 = smov 8  }
  0x48   : > { %713 = dma.hbm_to_vmem [thread:$0]  (!%p1045_p11), %s1043_s27, 1024, %s1049_s22, %s1051_s28, %s923_s20, %s923_s20, %s924_s26  }
  0x49   : > { %p1168_p0 = scmp.ne.s32.totalorder %s1163_s17, 0 }
  0x4a   : > { %s1082_s19 = sand.u32 (!%p1168_p0), 1, %s909_s10   ;;  %p1169_p5 = scmp.ne.s32.totalorder (!%p1168_p0), %s1161_s15, 0 }
  0x4b   : > { %147 = sbr.rel (%p1168_p0) target bundleno = 361 (0x169), region = 28  ;;  %s568_s29 = sshll.u32 (!%p1168_p0), %s1082_s19, 6 }
  0x4c   : > { %s150_s30 = scalar_lea.sflag (!%p1168_p0), [#allocation3], %s1082_s19  ;;  %s1086_s3 = scalar_lea.vmem (!%p1168_p0), [#allocation2], %s568_s29 }
  0x52   : > { %892 = dma.done.wait (%p1169_p5), %s150_s30, 1024  }
  0x53   : > { %894 = vsyncadd (%p1169_p5), %s150_s30, 4294966272  ;;  %p1170_p11 = scmp.eq.s32.totalorder %s964_s13, 0 }
  0x55   : > { %896 = dma.done.wait (%p1170_p11), [#allocation6], 2048   ;;  %p1171_p1 = pmov %p1170_p11 }
  0x56   : > { %v761_v0 = vld [vmem:[#allocation5 + $0x40] sm:$0xff]   ;;  %v763_v2 = vld [vmem:[#allocation5 + $0x48] sm:$0xff]   ;;  %v765_v4 = vld [vmem:[#allocation5 + $0x50] sm:$0xff]   ;;  %s570_s15 = sshll.u32 %s1082_s19, 5  ;;  %s618_s22 = sshll.u32 %s964_s13, 9 }
  0x57   : > { %898 = vsyncadd (%p1171_p1), [#allocation6], 4294965248  ;;  %v762_v1 = vld [vmem:[#allocation5] sm:$0xff]   ;;  %642 = vmatprep.subr.bf16.mxu0 %v761_v0  ;;  %682 = vmatprep.subr.bf16.mxu1 %v761_v0  ;;  %v764_v3 = vld [vmem:[#allocation5 + $0x8] sm:$0xff]   ;;  %s177_s17 = scalar_lea.vmem [#allocation7], %s570_s15  ;;  %s1111_s4 = scalar_lea.hbm %s1157_s2, %s618_s22 }
  0x58   : > { %643 = vmatpush3.bf16.msra.mxu0 %v762_v1  ;;  %690 = vmatpush3.bf16.msra.mxu1 %v762_v1  ;;  %v766_v5 = vld [vmem:[#allocation5 + $0x10] sm:$0xff]   ;;  %v767_v6 = vld [vmem:[#allocation5 + $0x58] sm:$0xff]   ;;  %v769_v8 = vld [vmem:[#allocation5 + $0x60] sm:$0xff]   ;;  %s476_s27 = sshll.u32 %s177_s17, 4  ;;  %s463_s5 = scalar_lea.sflag [#allocation4], %s1082_s19  ;;  %s1106_s27 = int_to_ptr.vmem [resolvable:$true] %s476_s27 }
  0x59   : > { %644 = vmatprep.subr.bf16.mxu0 %v763_v2  ;;  %683 = vmatprep.subr.bf16.mxu1 %v763_v2  ;;  %v768_v7 = vld [vmem:[#allocation5 + $0x18] sm:$0xff]   ;;  %v770_v9 = vld [vmem:[#allocation5 + $0x20] sm:$0xff]   ;;  %v771_v10 = vld [vmem:[#allocation5 + $0x68] sm:$0xff]   ;;  %s847_s13 = scalar_lea.vmem %s1106_s27, 512  ;;  %s925_s6 = smov [#allocation7]  }
  0x5a   : > { %v779_v11 = vld [vmem:[%s1086_s3 + $0x4] ss:$8 sps:$4 sm:$0xff]   ;;  %v773_v14 = vld [vmem:[#allocation5 + $0x70] sm:$0xff]   ;;  %v775_v16 = vld [vmem:[#allocation5 + $0x78] sm:$0xff]   ;;  %p848_p4 = scmp.ne.s32.totalorder %s1106_s27, %s847_s13  ;;  %s851_s7 = sshll.u32 %s925_s6, 4  ;;  %s852_s7 = int_to_ptr.vmem [resolvable:$false] %s851_s7 }
  0x5b   : > { %v782_v12 = vld [vmem:[%s1086_s3 + $0x24] ss:$8 sps:$4 sm:$0xff]   ;;  %389 = vmatprep.mubr.bf16.mxu0 %v779_v11  ;;  %v774_v15 = vld [vmem:[#allocation5 + $0x30] sm:$0xff]   ;;  %v776_v17 = vld [vmem:[#allocation5 + $0x38] sm:$0xff]   ;;  %s853_s18 = scalar_lea.vmem %s852_s7, 1024  ;;  %p854_p10 = scmp.lt.s32.totalorder %s1106_s27, %s852_s7 }
  0x5c   : > { %645 = vmatpush3.bf16.msra.mxu0 %v764_v3  ;;  %691 = vmatpush3.bf16.msra.mxu1 %v764_v3  ;;  %v772_v13 = vld [vmem:[#allocation5 + $0x28] sm:$0xff]   ;;  %v783_v20 = vld [vmem:[%s1086_s3 + $0x14] ss:$8 sps:$4 sm:$0xff]   ;;  %v787_v22 = vld [vmem:[%s1086_s3 + $0x10] ss:$8 sps:$4 sm:$0xff]   ;;  %p849_p6 = pnand %p848_p4, %p1034_p12  ;;  %p855_p13 = scmp.lt.s32.totalorder %s853_s18, %s847_s13 }
  0x5d   : > { %646 = vmatprep.subr.bf16.mxu0 %v765_v4  ;;  %684 = vmatprep.subr.bf16.mxu1 %v765_v4  ;;  %v777_v18 = vld [vmem:[%s1086_s3] ss:$8 sps:$4 sm:$0xff]   ;;  %v785_v21 = vld [vmem:[%s1086_s3 + $0x34] ss:$8 sps:$4 sm:$0xff]   ;;  %v788_v23 = vld [vmem:[%s1086_s3 + $0x30] ss:$8 sps:$4 sm:$0xff]  }
  0x5e   : > { %405 = vmatprep.mubr.bf16.mxu1 %v782_v12  ;;  %v780_v19 = vld [vmem:[%s1086_s3 + $0x20] ss:$8 sps:$4 sm:$0xff]   ;;  %p850_p8 = pneg %p849_p6  ;;  %p856_p3 = por %p855_p13, %p854_p10 }
  0x60   : > { %647 = vmatpush3.bf16.msra.mxu0 %v766_v5  ;;  %692 = vmatpush3.bf16.msra.mxu1 %v766_v5  ;;  %p857_p7 = pnand %p856_p3, %p850_p8 }
  0x61   : > { %648 = vmatprep.subr.bf16.mxu0 %v767_v6  ;;  %685 = vmatprep.subr.bf16.mxu1 %v767_v6 }
  0x64   : > { %649 = vmatpush3.bf16.msra.mxu0 %v768_v7  ;;  %693 = vmatpush3.bf16.msra.mxu1 %v768_v7 }
  0x65   : > { %650 = vmatprep.subr.bf16.mxu0 %v769_v8  ;;  %686 = vmatprep.subr.bf16.mxu1 %v769_v8 }
  0x68   : > { %651 = vmatpush3.bf16.msra.mxu0 %v770_v9  ;;  %694 = vmatpush3.bf16.msra.mxu1 %v770_v9 }
  0x69   : > { %652 = vmatprep.subr.bf16.mxu0 %v771_v10  ;;  %687 = vmatprep.subr.bf16.mxu1 %v771_v10 }
  0x6c   : > { %653 = vmatpush3.bf16.msra.mxu0 %v772_v13  ;;  %695 = vmatpush3.bf16.msra.mxu1 %v772_v13 }
  0x6d   : > { %654 = vmatprep.subr.bf16.mxu0 %v773_v14  ;;  %688 = vmatprep.subr.bf16.mxu1 %v773_v14 }
  0x70   : > { %655 = vmatpush3.bf16.msra.mxu0 %v774_v15  ;;  %696 = vmatpush3.bf16.msra.mxu1 %v774_v15 }
  0x71   : > { %656 = vmatprep.subr.bf16.mxu0 %v775_v16  ;;  %689 = vmatprep.subr.bf16.mxu1 %v775_v16 }
  0x74   : > { %657 = vmatpush3.bf16.msra.mxu0 %v776_v17  ;;  %697 = vmatpush3.bf16.msra.mxu1 %v776_v17 }
  0x77   : > { %390 = vmatmul.mubr.bf16.vlgmr.msra.gmra.mrb[0].mxu0 %v777_v18  ;;  %406 = vmatmul.mubr.bf16.vlgmr.msra.gmra.mrb[0].mxu1 %v780_v19 }
  0x78   : > { %397 = vmatprep.mubr.bf16.mxu0 %v783_v20  ;;  %413 = vmatprep.mubr.bf16.mxu1 %v785_v21 }
  0x7f   : > { %398 = vmatmul.mubr.bf16.gmra.mrb[4].mxu0 %v787_v22  ;;  %414 = vmatmul.mubr.bf16.gmra.mrb[4].mxu1 %v788_v23 }
 0x14a   : > { %v658_v24 = vpop.f32.mrb[0].mxu0  ;;  %v670_v25 = vpop.f32.mrb[0].mxu1 }
 0x14b   : > { %v659_v26 = vpop.f32.mrb[1].mxu0  ;;  %v671_v27 = vpop.f32.mrb[1].mxu1 }
 0x14c   : > { %v660_v28 = vadd.f32 %v659_v26, %v658_v24  ;;  %v672_v29 = vadd.f32 %v671_v27, %v670_v25  ;;  %v661_v30 = vpop.f32.mrb[2].mxu0  ;;  %v673_v31 = vpop.f32.mrb[2].mxu1 }
 0x14d   : > { %v662_v32 = vpop.f32.mrb[3].mxu0  ;;  %v674_v33 = vpop.f32.mrb[3].mxu1 }
 0x14e   : > { %v663_v34 = vadd.f32 %v662_v32, %v661_v30  ;;  %v675_v35 = vadd.f32 %v674_v33, %v673_v31 }
 0x150   : > { %v622_v36 = vpack.c.bf16 %v663_v34, %v660_v28  ;;  %v632_v37 = vpack.c.bf16 %v675_v35, %v672_v29 }
 0x152   : > { %623 = vst [vmem:[%s177_s17] sm:$0xff] %v622_v36   ;;  %640 = vst [vmem:[%s177_s17 + $0x10] sm:$0xff] %v632_v37   ;;  %v664_v38 = vpop.f32.mrb[4].mxu0  ;;  %v676_v39 = vpop.f32.mrb[4].mxu1 }
 0x153   : > { %v665_v40 = vpop.f32.mrb[5].mxu0  ;;  %v677_v41 = vpop.f32.mrb[5].mxu1 }
 0x154   : > { %v666_v42 = vadd.f32 %v665_v40, %v664_v38  ;;  %v678_v43 = vadd.f32 %v677_v41, %v676_v39  ;;  %v667_v44 = vpop.f32.mrb[6].mxu0  ;;  %v679_v45 = vpop.f32.mrb[6].mxu1 }
 0x155   : > { %v668_v46 = vpop.f32.mrb[7].mxu0  ;;  %v680_v47 = vpop.f32.mrb[7].mxu1 }
 0x156   : > { %v669_v48 = vadd.f32 %v668_v46, %v667_v44  ;;  %v681_v49 = vadd.f32 %v680_v47, %v679_v45 }
 0x158   : > { %v627_v50 = vpack.c.bf16 %v669_v48, %v666_v42  ;;  %v637_v51 = vpack.c.bf16 %v681_v49, %v678_v43 }
 0x15a   : > { %639 = vst [vmem:[%s177_s17 + $0x8] sm:$0xff] %v627_v50   ;;  %641 = vst [vmem:[%s177_s17 + $0x18] sm:$0xff] %v637_v51  }
 0x15b   : > { %860 = shalt.err (!%p857_p7)
}
 0x15c   : > { %s861_s24 = scalar_lea.hbm %s1111_s4, 512  ;;  %s865_s26 = scalar_lea.hbm %s1157_s2, 1024 }
 0x15d   : > { %p862_p9 = scmp.ne.s32.totalorder %s1111_s4, %s861_s24  ;;  %p866_p5 = scmp.lt.u32.totalorder %s1111_s4, %s1157_s2 }
 0x15e   : > { %p867_p11 = scmp.lt.u32.totalorder %s865_s26, %s861_s24  ;;  %p869_p4 = scmp.lt.u32.totalorder %s861_s24, %s1111_s4 }
 0x15f   : > { %p863_p2 = pnand %p862_p9, %p1034_p12 }
 0x160   : > { %p868_p1 = por %p867_p11, %p866_p5 }
 0x161   : > { %p864_p0 = pneg %p863_p2 }
 0x162   : > { %p870_p6 = por %p869_p4, %p868_p1 }
 0x164   : > { %p871_p8 = pnand %p870_p6, %p864_p0 }
 0x166   : > { %874 = shalt.err (!%p871_p8)
}
 0x167   : > { %s926_s3 = smov 64   ;;  %s927_s15 = smov 4  }
 0x168   : > { %704 = dma.vmem_to_hbm [thread:$0]  (%p1034_p12), %s1106_s27, 512, %s1111_s4, %s463_s5, %s926_s3, %s926_s3, %s927_s15  }
 0x169 PF: > { %s491_s17 = sand.u32 1, %s905_s9   ;;  %p1172_p10 = scmp.ne.s32.totalorder %s1162_s16, 0 }
 0x16a   : > { %p1173_p13 = scmp.ge.s32.totalorder %s917_s12, 2  ;;  %s492_s22 = scalar_lea.sflag [#allocation4], %s491_s17 }
 0x16c   : > { %p715_p3 = pnand %p1173_p13, %p1172_p10 }
 0x16e   : > { %900 = dma.done.wait (!%p715_p3), %s492_s22, 512  }
 0x16f   : > { %902 = vsyncadd (!%p715_p3), %s492_s22, 4294966784  ;;  %p16_p7 = scmp.ge.s32.totalorder %s999_s21, 4   ;;  %s1174_s9 = smov %s909_s10 }
 0x170   : > { %s1175_s10 = smov %s913_s11  ;;  %s1176_s11 = smov %s1030_s8 }
 0x171   : > { %s1177_s12 = smov %s999_s21  ;;  %18 = sbr.rel (!%p16_p7) target bundleno = 6 (0x6), region = 77 }
 0x178   :  { %497 = vsyncpa [#allocation3], 1 }
 0x179   :  { %499 = vsyncpa [#allocation3 + $0x1], 1 }
 0x17a   :  { %500 = vsyncpa [#allocation6], 1 }
 0x17b   :  { %501 = vsyncpa [#allocation4], 1 }
 0x17c   :  { %503 = vsyncpa [#allocation4 + $0x1], 1 }

</bundles_post_ra>
